<compile_context>
chip_gen: v7x
topology: tpu7x:2x2x1
jax: 0.10.0
libtpu: 0.0.40
codegen_flags: <defaults>
</compile_context>

<pallas_src>
import functools

import jax
import jax.numpy as jnp
from jax.experimental import pallas as pl
from jax.experimental.pallas import tpu as pltpu

_EPS = 1e-5


def _branch2_kernel(x2_ref, w1_ref, w2_ref, dcat_ref, gb_ref, o_ref,
                    *, H, cb, inv_count):
    """Fused branch2: 1x1+BN+ReLU -> 3x3 dw+BN -> 1x1+BN+ReLU on packed (N*H, W*cb)."""
    f32 = jnp.float32
    NH, L = o_ref.shape
    gb = gb_ref[...]                      # (6, L): [g1, b1, gdw, bdw, g2, b2]

    def bn(y, gamma, beta, relu):
        # Training-mode BatchNorm (biased variance over N,H,W per ORIGINAL channel),
        # fused into one per-lane scale/shift FMA.  Per-channel pooling of the
        # column stats over the W lane-groups is a log2(W) lane-roll reduction
        # (circular lane shifts by multiples of cb stay within one channel's lanes),
        # so no MXU op and no pooling constant are needed.
        col_sum = jnp.sum(y, axis=0, keepdims=True)          # (1, L)
        col_sq = jnp.sum(y * y, axis=0, keepdims=True)       # (1, L)
        stats = jnp.concatenate([col_sum, col_sq], axis=0)   # (2, L)
        shift = cb
        while shift < L:                                     # static trace-time loop
            stats = stats + pltpu.roll(stats, shift=shift, axis=1)
            shift *= 2
        mu = stats[0:1] * inv_count                          # E[x]   per lane
        ex2 = stats[1:2] * inv_count                         # E[x^2] per lane
        var = ex2 - mu * mu
        s = gamma * jax.lax.rsqrt(var + _EPS)                # EUP rsqrt
        t = beta - mu * s
        out = y * s + t
        return jnp.maximum(out, 0.0) if relu else out

    # --- 1x1 conv #1 (block-diagonal, lane-dense MXU matmul) + BN + ReLU ---
    y = jnp.dot(x2_ref[...], w1_ref[...], preferred_element_type=f32)
    y = bn(y, gb[0:1], gb[1:2], relu=True)

    # --- 3x3 depthwise conv (stride 1, pad 1) ---
    # All W-taps and per-channel weights for the three kernel rows live in one wide
    # (L, 3L) band matrix -> a single MXU matmul; the +/-1 H-taps are sublane rolls
    # with an image-boundary mask (zero padding implicit).
    r = jnp.dot(y, dcat_ref[...], preferred_element_type=f32)      # (NH, 3L)
    r0 = r[:, 0 * L:1 * L]        # kernel row di = 0  (needs input row h-1)
    r1 = r[:, 1 * L:2 * L]        # kernel row di = 1  (input row h)
    r2 = r[:, 2 * L:3 * L]        # kernel row di = 2  (input row h+1)

    h_idx = jax.lax.broadcasted_iota(jnp.int32, (NH, L), 0) % H
    acc = r1
    acc = acc + jnp.where(h_idx != 0,
                          pltpu.roll(r0, shift=1, axis=0), 0.0)      # out[h] += r0[h-1]
    acc = acc + jnp.where(h_idx != H - 1,
                          pltpu.roll(r2, shift=NH - 1, axis=0), 0.0)  # out[h] += r2[h+1]
    z = bn(acc, gb[2:3], gb[3:4], relu=False)                         # BN, no ReLU

    # --- 1x1 conv #2 (block-diagonal MXU matmul) + BN + ReLU ---
    o = jnp.dot(z, w2_ref[...], preferred_element_type=f32)
    o_ref[...] = bn(o, gb[4:5], gb[5:6], relu=True)


def pack_inverted_residual_params(params, W):
    """One-time weight packing (call ONCE, outside the jitted forward)."""
    f32 = jnp.float32
    cb = params["w1"].shape[0]
    L = W * cb
    eye_w = jnp.eye(W, dtype=f32)

    # Block-diagonal 1x1-conv weights: (W*cb, W*cb) = kron(I_W, (cin, cout)).
    w1_bd = jnp.kron(eye_w, params["w1"].astype(f32))
    w2_bd = jnp.kron(eye_w, params["w2"].astype(f32))

    # Depthwise 3x3: one banded (L, L) block matrix per kernel row di, concatenated
    # along the output axis into a single (L, 3L) weight for one wide MXU matmul.
    wdw = params["wdw"].astype(f32)                  # (3, 3, cb)
    dmats = []
    for di in range(3):
        m = jnp.zeros((L, L), f32)
        for dj_idx, dj in enumerate((-1, 0, 1)):
            m = m + jnp.kron(jnp.eye(W, k=-dj, dtype=f32), jnp.diag(wdw[di, dj_idx]))
        dmats.append(m)
    dcat = jnp.concatenate(dmats, axis=1)            # (L, 3L)

    def pk(v):                                       # per-channel (1, cb) -> packed (1, L)
        return jnp.tile(v.astype(f32).reshape(1, cb), (1, W))

    gb = jnp.concatenate(
        [pk(params["g1"]), pk(params["b1"]),
         pk(params["gdw"]), pk(params["bdw"]),
         pk(params["g2"]), pk(params["b2"])], axis=0)   # (6, L)

    return {"w1_bd": w1_bd, "w2_bd": w2_bd, "dcat": dcat, "gb": gb}


def inverted_residual_forward(x_nchw, packed):
    """stride == 1 forward of ShuffleNetV2 InvertedResidual (NCHW in / NCHW out)."""
    N, Cin, H, W = x_nchw.shape
    cb = Cin // 2                   # branch_features
    L = W * cb                      # packed lane width
    NH = N * H
    assert W & (W - 1) == 0, "lane-roll BN pooling assumes power-of-two W"
    f32 = jnp.float32

    # Pack NCHW -> lane-dense (N*H, W*cb): lane index = w*cb + c.
    x_nhwc = jnp.transpose(x_nchw, (0, 2, 3, 1)).astype(f32)
    x1 = x_nhwc[..., :cb]                               # identity branch (x.chunk(2)[0])
    x2_pk = x_nhwc[..., cb:].reshape(NH, L)             # processed by branch2

    kernel = functools.partial(_branch2_kernel, H=H, cb=cb,
                               inv_count=1.0 / float(N * H * W))
    vmem = pl.BlockSpec(memory_space=pltpu.MemorySpace.VMEM)

    b2_pk = pl.pallas_call(
        kernel,
        out_shape=jax.ShapeDtypeStruct((NH, L), f32),
        in_specs=[vmem] * 5,
        out_specs=vmem,
    )(x2_pk, packed["w1_bd"], packed["w2_bd"], packed["dcat"], packed["gb"])

    # concat + channel_shuffle(groups=2): output channel k = 2*c + g
    # (g=0 -> identity branch, g=1 -> branch2), then back to NCHW.
    b2 = b2_pk.reshape(N, H, W, cb)
    out = jnp.stack([x1, b2], axis=-1).reshape(N, H, W, 2 * cb)
    return jnp.transpose(out, (0, 3, 1, 2))


def _reference_forward(x_nchw, params):
    """Pure-JAX reference (independent code path, two-pass BN) for self-checking."""
    N, Cin, H, W = x_nchw.shape
    cb = Cin // 2
    x = jnp.transpose(x_nchw, (0, 2, 3, 1)).astype(jnp.float32)
    x1, x2 = x[..., :cb], x[..., cb:]

    def bn(y, g, b):
        mu = y.mean((0, 1, 2), keepdims=True)
        var = ((y - mu) ** 2).mean((0, 1, 2), keepdims=True)
        return (y - mu) * jax.lax.rsqrt(var + _EPS) * g.reshape(1, 1, 1, -1) \
               + b.reshape(1, 1, 1, -1)

    y = jnp.einsum('nhwc,cd->nhwd', x2, params["w1"])
    y = jnp.maximum(bn(y, params["g1"], params["b1"]), 0.0)
    yp = jnp.pad(y, ((0, 0), (1, 1), (1, 1), (0, 0)))
    acc = jnp.zeros_like(y)
    for di in range(3):
        for dj in range(3):
            acc = acc + yp[:, di:di + H, dj:dj + W, :] * params["wdw"][di, dj].reshape(1, 1, 1, -1)
    z = bn(acc, params["gdw"], params["bdw"])
    o = jnp.einsum('nhwc,cd->nhwd', z, params["w2"])
    o = jnp.maximum(bn(o, params["g2"], params["b2"]), 0.0)
    cat = jnp.concatenate([x1, o], axis=-1)
    out = cat.reshape(N, H, W, 2, cb).transpose(0, 1, 2, 4, 3).reshape(N, H, W, 2 * cb)
    return jnp.transpose(out, (0, 3, 1, 2))


if __name__ == "__main__":
    # Module config: inp = oup = 16, stride = 1  ->  branch_features = 8.
    N, C, H, W = 2, 16, 16, 16
    cb = C // 2

    key = jax.random.PRNGKey(0)
    keys = jax.random.split(key, 10)
    params = {
        "w1":  jax.random.normal(keys[0], (cb, cb), jnp.float32) * 0.2,    # 1x1 conv (cin, cout)
        "g1":  1.0 + 0.1 * jax.random.normal(keys[1], (1, cb), jnp.float32),
        "b1":  0.1 * jax.random.normal(keys[2], (1, cb), jnp.float32),
        "wdw": jax.random.normal(keys[3], (3, 3, cb), jnp.float32) * 0.2,  # depthwise 3x3
        "gdw": 1.0 + 0.1 * jax.random.normal(keys[4], (1, cb), jnp.float32),
        "bdw": 0.1 * jax.random.normal(keys[5], (1, cb), jnp.float32),
        "w2":  jax.random.normal(keys[6], (cb, cb), jnp.float32) * 0.2,
        "g2":  1.0 + 0.1 * jax.random.normal(keys[7], (1, cb), jnp.float32),
        "b2":  0.1 * jax.random.normal(keys[8], (1, cb), jnp.float32),
    }
    x = jax.random.normal(keys[9], (N, C, H, W), jnp.float32)

    # One-time weight packing (hoisted out of the forward).
    packed = jax.block_until_ready(
        jax.tree_util.tree_map(lambda a: a, pack_inverted_residual_params(params, W)))

    fwd = jax.jit(inverted_residual_forward)
    out = jax.block_until_ready(fwd(x, packed))
    ref = jax.block_until_ready(_reference_forward(x, params))

    assert out.shape == (N, C, H, W), out.shape
    err = float(jnp.max(jnp.abs(out - ref)))
    if err > 2e-4:
        raise AssertionError(f"Pallas kernel mismatch vs JAX reference, max abs err = {err}")
    print("KERNEL_OK")
</pallas_src>

<mosaic_0001>
module attributes {stable_mosaic.version = 11 : i64} {
  func.func @_branch2_kernel(%arg0: memref<32x128xf32, #tpu.memory_space<vmem>>, %arg1: memref<128x128xf32, #tpu.memory_space<vmem>>, %arg2: memref<128x128xf32, #tpu.memory_space<vmem>>, %arg3: memref<128x384xf32, #tpu.memory_space<vmem>>, %arg4: memref<6x128xf32, #tpu.memory_space<vmem>>, %arg5: memref<32x128xf32, #tpu.memory_space<vmem>>) attributes {dimension_semantics = [], scalar_prefetch = 0 : i64, scratch_operands = 0 : i64, tpu.core_type = #tpu.core_type<tc>} {
    %c0 = arith.constant 0 : index
    %c0_0 = arith.constant 0 : index
    %0 = vector.load %arg4[%c0, %c0_0] : memref<6x128xf32, #tpu.memory_space<vmem>>, vector<6x128xf32>
    %c0_1 = arith.constant 0 : index
    %c0_2 = arith.constant 0 : index
    %1 = vector.load %arg0[%c0_1, %c0_2] : memref<32x128xf32, #tpu.memory_space<vmem>>, vector<32x128xf32>
    %c0_3 = arith.constant 0 : index
    %c0_4 = arith.constant 0 : index
    %2 = vector.load %arg1[%c0_3, %c0_4] : memref<128x128xf32, #tpu.memory_space<vmem>>, vector<128x128xf32>
    %cst = arith.constant dense<0.000000e+00> : vector<32x128xf32>
    %3 = tpu.matmul %1, %2, %cst {dimension_numbers = #tpu.dot_dimension_numbers<[1], [0], [0], [1], [0, 0, 1, 1], [], []>} : vector<32x128xf32>, vector<128x128xf32>, vector<32x128xf32> -> vector<32x128xf32>
    %4 = vector.extract_strided_slice %0 {offsets = [0, 0], sizes = [1, 128], strides = [1, 1]} : vector<6x128xf32> to vector<1x128xf32>
    %5 = vector.extract_strided_slice %0 {offsets = [1, 0], sizes = [1, 128], strides = [1, 1]} : vector<6x128xf32> to vector<1x128xf32>
    %cst_5 = arith.constant dense<0.000000e+00> : vector<128xf32>
    %6 = vector.multi_reduction <add>, %3, %cst_5 [0] : vector<32x128xf32> to vector<128xf32>
    %7 = vector.shape_cast %6 : vector<128xf32> to vector<1x128xf32>
    %8 = arith.mulf %3, %3 : vector<32x128xf32>
    %cst_6 = arith.constant dense<0.000000e+00> : vector<128xf32>
    %9 = vector.multi_reduction <add>, %8, %cst_6 [0] : vector<32x128xf32> to vector<128xf32>
    %10 = vector.shape_cast %9 : vector<128xf32> to vector<1x128xf32>
    %11 = tpu.concatenate %7, %10 in 0 : vector<1x128xf32>, vector<1x128xf32> -> vector<2x128xf32>
    %c8_i32 = arith.constant 8 : i32
    %12 = tpu.dynamic_rotate %11 by %c8_i32 dim 1 : vector<2x128xf32>, i32 -> vector<2x128xf32>
    %13 = arith.addf %11, %12 : vector<2x128xf32>
    %c16_i32 = arith.constant 16 : i32
    %14 = tpu.dynamic_rotate %13 by %c16_i32 dim 1 : vector<2x128xf32>, i32 -> vector<2x128xf32>
    %15 = arith.addf %13, %14 : vector<2x128xf32>
    %c32_i32 = arith.constant 32 : i32
    %16 = tpu.dynamic_rotate %15 by %c32_i32 dim 1 : vector<2x128xf32>, i32 -> vector<2x128xf32>
    %17 = arith.addf %15, %16 : vector<2x128xf32>
    %c64_i32 = arith.constant 64 : i32
    %18 = tpu.dynamic_rotate %17 by %c64_i32 dim 1 : vector<2x128xf32>, i32 -> vector<2x128xf32>
    %19 = arith.addf %17, %18 : vector<2x128xf32>
    %20 = vector.extract_strided_slice %19 {offsets = [0, 0], sizes = [1, 128], strides = [1, 1]} : vector<2x128xf32> to vector<1x128xf32>
    %cst_7 = arith.constant 0.001953125 : f32
    %21 = vector.broadcast %cst_7 : f32 to vector<1x128xf32>
    %22 = arith.mulf %20, %21 : vector<1x128xf32>
    %23 = vector.extract_strided_slice %19 {offsets = [1, 0], sizes = [1, 128], strides = [1, 1]} : vector<2x128xf32> to vector<1x128xf32>
    %cst_8 = arith.constant 0.001953125 : f32
    %24 = vector.broadcast %cst_8 : f32 to vector<1x128xf32>
    %25 = arith.mulf %23, %24 : vector<1x128xf32>
    %26 = arith.mulf %22, %22 : vector<1x128xf32>
    %27 = arith.subf %25, %26 : vector<1x128xf32>
    %cst_9 = arith.constant 9.99999974E-6 : f32
    %28 = vector.broadcast %cst_9 : f32 to vector<1x128xf32>
    %29 = arith.addf %27, %28 : vector<1x128xf32>
    %30 = math.rsqrt %29 : vector<1x128xf32>
    %31 = arith.mulf %4, %30 : vector<1x128xf32>
    %32 = arith.mulf %22, %31 : vector<1x128xf32>
    %33 = arith.subf %5, %32 : vector<1x128xf32>
    %34 = vector.broadcast %31 : vector<1x128xf32> to vector<32x128xf32>
    %35 = arith.mulf %3, %34 : vector<32x128xf32>
    %36 = vector.broadcast %33 : vector<1x128xf32> to vector<32x128xf32>
    %37 = arith.addf %35, %36 : vector<32x128xf32>
    %cst_10 = arith.constant 0.000000e+00 : f32
    %38 = vector.broadcast %cst_10 : f32 to vector<32x128xf32>
    %39 = arith.maximumf %37, %38 : vector<32x128xf32>
    %c0_11 = arith.constant 0 : index
    %c0_12 = arith.constant 0 : index
    %40 = vector.load %arg3[%c0_11, %c0_12] : memref<128x384xf32, #tpu.memory_space<vmem>>, vector<128x384xf32>
    %cst_13 = arith.constant dense<0.000000e+00> : vector<32x384xf32>
    %41 = tpu.matmul %39, %40, %cst_13 {dimension_numbers = #tpu.dot_dimension_numbers<[1], [0], [0], [1], [0, 0, 1, 1], [], []>} : vector<32x128xf32>, vector<128x384xf32>, vector<32x384xf32> -> vector<32x384xf32>
    %42 = vector.extract_strided_slice %41 {offsets = [0, 0], sizes = [32, 128], strides = [1, 1]} : vector<32x384xf32> to vector<32x128xf32>
    %43 = vector.extract_strided_slice %41 {offsets = [0, 128], sizes = [32, 128], strides = [1, 1]} : vector<32x384xf32> to vector<32x128xf32>
    %44 = vector.extract_strided_slice %41 {offsets = [0, 256], sizes = [32, 128], strides = [1, 1]} : vector<32x384xf32> to vector<32x128xf32>
    %45 = tpu.iota {dimensions = array<i32: 0>} : vector<32x128xi32>
    %c16_i32_14 = arith.constant 16 : i32
    %c0_i32 = arith.constant 0 : i32
    %46 = arith.cmpi eq, %c16_i32_14, %c0_i32 : i32
    %c1_i32 = arith.constant 1 : i32
    %47 = arith.select %46, %c1_i32, %c16_i32_14 : i32
    %48 = vector.broadcast %47 : i32 to vector<32x128xi32>
    %49 = arith.remsi %45, %48 : vector<32x128xi32>
    %c0_i32_15 = arith.constant 0 : i32
    %50 = vector.broadcast %c0_i32_15 : i32 to vector<32x128xi32>
    %51 = arith.cmpi ne, %49, %50 : vector<32x128xi32>
    %c0_i32_16 = arith.constant 0 : i32
    %52 = vector.broadcast %c0_i32_16 : i32 to vector<32x128xi32>
    %53 = arith.cmpi slt, %49, %52 : vector<32x128xi32>
    %c0_i32_17 = arith.constant 0 : i32
    %54 = arith.cmpi slt, %47, %c0_i32_17 : i32
    %55 = vector.broadcast %54 : i1 to vector<32x128xi1>
    %56 = vector.broadcast %55 : vector<32x128xi1> to vector<32x128xi1>
    %57 = arith.xori %53, %56 : vector<32x128xi1>
    %58 = arith.andi %57, %51 : vector<32x128xi1>
    %59 = vector.broadcast %47 : i32 to vector<32x128xi32>
    %60 = arith.addi %49, %59 : vector<32x128xi32>
    %61 = arith.select %58, %60, %49 : vector<32x128xi1>, vector<32x128xi32>
    %c0_i32_18 = arith.constant 0 : i32
    %62 = vector.broadcast %c0_i32_18 : i32 to vector<32x128xi32>
    %63 = arith.cmpi ne, %61, %62 : vector<32x128xi32>
    %c1_i32_19 = arith.constant 1 : i32
    %64 = tpu.dynamic_rotate %42 by %c1_i32_19 dim 0 : vector<32x128xf32>, i32 -> vector<32x128xf32>
    %cst_20 = arith.constant 0.000000e+00 : f32
    %65 = vector.broadcast %cst_20 : f32 to vector<32x128xf32>
    %66 = arith.select %63, %64, %65 : vector<32x128xi1>, vector<32x128xf32>
    %67 = arith.addf %43, %66 : vector<32x128xf32>
    %c15_i32 = arith.constant 15 : i32
    %68 = vector.broadcast %c15_i32 : i32 to vector<32x128xi32>
    %69 = arith.cmpi ne, %61, %68 : vector<32x128xi32>
    %c31_i32 = arith.constant 31 : i32
    %70 = tpu.dynamic_rotate %44 by %c31_i32 dim 0 : vector<32x128xf32>, i32 -> vector<32x128xf32>
    %cst_21 = arith.constant 0.000000e+00 : f32
    %71 = vector.broadcast %cst_21 : f32 to vector<32x128xf32>
    %72 = arith.select %69, %70, %71 : vector<32x128xi1>, vector<32x128xf32>
    %73 = arith.addf %67, %72 : vector<32x128xf32>
    %74 = vector.extract_strided_slice %0 {offsets = [2, 0], sizes = [1, 128], strides = [1, 1]} : vector<6x128xf32> to vector<1x128xf32>
    %75 = vector.extract_strided_slice %0 {offsets = [3, 0], sizes = [1, 128], strides = [1, 1]} : vector<6x128xf32> to vector<1x128xf32>
    %cst_22 = arith.constant dense<0.000000e+00> : vector<128xf32>
    %76 = vector.multi_reduction <add>, %73, %cst_22 [0] : vector<32x128xf32> to vector<128xf32>
    %77 = vector.shape_cast %76 : vector<128xf32> to vector<1x128xf32>
    %78 = arith.mulf %73, %73 : vector<32x128xf32>
    %cst_23 = arith.constant dense<0.000000e+00> : vector<128xf32>
    %79 = vector.multi_reduction <add>, %78, %cst_23 [0] : vector<32x128xf32> to vector<128xf32>
    %80 = vector.shape_cast %79 : vector<128xf32> to vector<1x128xf32>
    %81 = tpu.concatenate %77, %80 in 0 : vector<1x128xf32>, vector<1x128xf32> -> vector<2x128xf32>
    %c8_i32_24 = arith.constant 8 : i32
    %82 = tpu.dynamic_rotate %81 by %c8_i32_24 dim 1 : vector<2x128xf32>, i32 -> vector<2x128xf32>
    %83 = arith.addf %81, %82 : vector<2x128xf32>
    %c16_i32_25 = arith.constant 16 : i32
    %84 = tpu.dynamic_rotate %83 by %c16_i32_25 dim 1 : vector<2x128xf32>, i32 -> vector<2x128xf32>
    %85 = arith.addf %83, %84 : vector<2x128xf32>
    %c32_i32_26 = arith.constant 32 : i32
    %86 = tpu.dynamic_rotate %85 by %c32_i32_26 dim 1 : vector<2x128xf32>, i32 -> vector<2x128xf32>
    %87 = arith.addf %85, %86 : vector<2x128xf32>
    %c64_i32_27 = arith.constant 64 : i32
    %88 = tpu.dynamic_rotate %87 by %c64_i32_27 dim 1 : vector<2x128xf32>, i32 -> vector<2x128xf32>
    %89 = arith.addf %87, %88 : vector<2x128xf32>
    %90 = vector.extract_strided_slice %89 {offsets = [0, 0], sizes = [1, 128], strides = [1, 1]} : vector<2x128xf32> to vector<1x128xf32>
    %cst_28 = arith.constant 0.001953125 : f32
    %91 = vector.broadcast %cst_28 : f32 to vector<1x128xf32>
    %92 = arith.mulf %90, %91 : vector<1x128xf32>
    %93 = vector.extract_strided_slice %89 {offsets = [1, 0], sizes = [1, 128], strides = [1, 1]} : vector<2x128xf32> to vector<1x128xf32>
    %cst_29 = arith.constant 0.001953125 : f32
    %94 = vector.broadcast %cst_29 : f32 to vector<1x128xf32>
    %95 = arith.mulf %93, %94 : vector<1x128xf32>
    %96 = arith.mulf %92, %92 : vector<1x128xf32>
    %97 = arith.subf %95, %96 : vector<1x128xf32>
    %cst_30 = arith.constant 9.99999974E-6 : f32
    %98 = vector.broadcast %cst_30 : f32 to vector<1x128xf32>
    %99 = arith.addf %97, %98 : vector<1x128xf32>
    %100 = math.rsqrt %99 : vector<1x128xf32>
    %101 = arith.mulf %74, %100 : vector<1x128xf32>
    %102 = arith.mulf %92, %101 : vector<1x128xf32>
    %103 = arith.subf %75, %102 : vector<1x128xf32>
    %104 = vector.broadcast %101 : vector<1x128xf32> to vector<32x128xf32>
    %105 = arith.mulf %73, %104 : vector<32x128xf32>
    %106 = vector.broadcast %103 : vector<1x128xf32> to vector<32x128xf32>
    %107 = arith.addf %105, %106 : vector<32x128xf32>
    %c0_31 = arith.constant 0 : index
    %c0_32 = arith.constant 0 : index
    %108 = vector.load %arg2[%c0_31, %c0_32] : memref<128x128xf32, #tpu.memory_space<vmem>>, vector<128x128xf32>
    %cst_33 = arith.constant dense<0.000000e+00> : vector<32x128xf32>
    %109 = tpu.matmul %107, %108, %cst_33 {dimension_numbers = #tpu.dot_dimension_numbers<[1], [0], [0], [1], [0, 0, 1, 1], [], []>} : vector<32x128xf32>, vector<128x128xf32>, vector<32x128xf32> -> vector<32x128xf32>
    %110 = vector.extract_strided_slice %0 {offsets = [4, 0], sizes = [1, 128], strides = [1, 1]} : vector<6x128xf32> to vector<1x128xf32>
    %111 = vector.extract_strided_slice %0 {offsets = [5, 0], sizes = [1, 128], strides = [1, 1]} : vector<6x128xf32> to vector<1x128xf32>
    %cst_34 = arith.constant dense<0.000000e+00> : vector<128xf32>
    %112 = vector.multi_reduction <add>, %109, %cst_34 [0] : vector<32x128xf32> to vector<128xf32>
    %113 = vector.shape_cast %112 : vector<128xf32> to vector<1x128xf32>
    %114 = arith.mulf %109, %109 : vector<32x128xf32>
    %cst_35 = arith.constant dense<0.000000e+00> : vector<128xf32>
    %115 = vector.multi_reduction <add>, %114, %cst_35 [0] : vector<32x128xf32> to vector<128xf32>
    %116 = vector.shape_cast %115 : vector<128xf32> to vector<1x128xf32>
    %117 = tpu.concatenate %113, %116 in 0 : vector<1x128xf32>, vector<1x128xf32> -> vector<2x128xf32>
    %c8_i32_36 = arith.constant 8 : i32
    %118 = tpu.dynamic_rotate %117 by %c8_i32_36 dim 1 : vector<2x128xf32>, i32 -> vector<2x128xf32>
    %119 = arith.addf %117, %118 : vector<2x128xf32>
    %c16_i32_37 = arith.constant 16 : i32
    %120 = tpu.dynamic_rotate %119 by %c16_i32_37 dim 1 : vector<2x128xf32>, i32 -> vector<2x128xf32>
    %121 = arith.addf %119, %120 : vector<2x128xf32>
    %c32_i32_38 = arith.constant 32 : i32
    %122 = tpu.dynamic_rotate %121 by %c32_i32_38 dim 1 : vector<2x128xf32>, i32 -> vector<2x128xf32>
    %123 = arith.addf %121, %122 : vector<2x128xf32>
    %c64_i32_39 = arith.constant 64 : i32
    %124 = tpu.dynamic_rotate %123 by %c64_i32_39 dim 1 : vector<2x128xf32>, i32 -> vector<2x128xf32>
    %125 = arith.addf %123, %124 : vector<2x128xf32>
    %126 = vector.extract_strided_slice %125 {offsets = [0, 0], sizes = [1, 128], strides = [1, 1]} : vector<2x128xf32> to vector<1x128xf32>
    %cst_40 = arith.constant 0.001953125 : f32
    %127 = vector.broadcast %cst_40 : f32 to vector<1x128xf32>
    %128 = arith.mulf %126, %127 : vector<1x128xf32>
    %129 = vector.extract_strided_slice %125 {offsets = [1, 0], sizes = [1, 128], strides = [1, 1]} : vector<2x128xf32> to vector<1x128xf32>
    %cst_41 = arith.constant 0.001953125 : f32
    %130 = vector.broadcast %cst_41 : f32 to vector<1x128xf32>
    %131 = arith.mulf %129, %130 : vector<1x128xf32>
    %132 = arith.mulf %128, %128 : vector<1x128xf32>
    %133 = arith.subf %131, %132 : vector<1x128xf32>
    %cst_42 = arith.constant 9.99999974E-6 : f32
    %134 = vector.broadcast %cst_42 : f32 to vector<1x128xf32>
    %135 = arith.addf %133, %134 : vector<1x128xf32>
    %136 = math.rsqrt %135 : vector<1x128xf32>
    %137 = arith.mulf %110, %136 : vector<1x128xf32>
    %138 = arith.mulf %128, %137 : vector<1x128xf32>
    %139 = arith.subf %111, %138 : vector<1x128xf32>
    %140 = vector.broadcast %137 : vector<1x128xf32> to vector<32x128xf32>
    %141 = arith.mulf %109, %140 : vector<32x128xf32>
    %142 = vector.broadcast %139 : vector<1x128xf32> to vector<32x128xf32>
    %143 = arith.addf %141, %142 : vector<32x128xf32>
    %cst_43 = arith.constant 0.000000e+00 : f32
    %144 = vector.broadcast %cst_43 : f32 to vector<32x128xf32>
    %145 = arith.maximumf %143, %144 : vector<32x128xf32>
    %c0_44 = arith.constant 0 : index
    %c0_45 = arith.constant 0 : index
    %146 = vector.load %arg5[%c0_44, %c0_45] : memref<32x128xf32, #tpu.memory_space<vmem>>, vector<32x128xf32>
    tpu.vector_store %arg5[%c0_44, %c0_45], %145 {strides = array<i32>} : memref<32x128xf32, #tpu.memory_space<vmem>>, vector<32x128xf32>,
    return
  }
}

</mosaic_0001>

<bundles_post_ra>
// kernel: inverted_residual_forward.1
= control target key start
LH: loop header
LB: loop body
LE: loop exit
PB: predicated region body
PF: predicated region fallthrough
CT: control target
= control target key end

     0   :  { %vm148_vm0 = vcmask 1040384   ;;  %s1086_s8 = smov 32   ;;  %s1087_s13 = smov 64   ;;  %s1491_s1 = inlined_call_operand.vmem [shape: f32[128,128], index: 1, kind: input, shape index: {}]   ;;  %s1492_s0 = inlined_call_operand.vmem [shape: f32[32,128], index: 0, kind: input, shape index: {}]   ;;  %s1493_s3 = inlined_call_operand.vmem [shape: f32[128,384], index: 3, kind: input, shape index: {}]   ;;  %s1494_s4 = inlined_call_operand.vmem [shape: f32[6,128], index: 4, kind: input, shape index: {}]   ;;  %s1495_s2 = inlined_call_operand.vmem [shape: f32[128,128], index: 2, kind: input, shape index: {}]   ;;  %s1496_s5 = inlined_call_operand.vmem [shape: f32[32,128], index: 5, kind: output, shape index: {}]  }
   0x1   :  { %v25_v0 = vld [vmem:[%s1491_s1] sm:$0xff]  ;;  %v26_v1 = vld [vmem:[%s1491_s1 + $0x8] sm:$0xff]  ;;  %v27_v2 = vld [vmem:[%s1491_s1 + $0x10] sm:$0xff] }
   0x2   :  { %v945_v3 = vpack.c.bf16 %v26_v1, %v25_v0  ;;  %v28_v4 = vld [vmem:[%s1491_s1 + $0x18] sm:$0xff]  ;;  %v29_v6 = vld [vmem:[%s1491_s1 + $0x20] sm:$0xff]  ;;  %v30_v7 = vld [vmem:[%s1491_s1 + $0x28] sm:$0xff] }
   0x3   :  { %v949_v5 = vpack.c.bf16 %v28_v4, %v27_v2  ;;  %v953_v8 = vpack.c.bf16 %v30_v7, %v29_v6  ;;  %v21_v9 = vld [vmem:[%s1492_s0] sm:$0xff]  ;;  %v31_v10 = vld [vmem:[%s1491_s1 + $0x30] sm:$0xff]  ;;  %v32_v11 = vld [vmem:[%s1491_s1 + $0x38] sm:$0xff] }
   0x4   :  { %946 = vmatprep.subr.bf16.mxu0 %v945_v3  ;;  %863 = vmatprep.mubr.f32.mxu0 %v21_v9  ;;  %v957_v12 = vpack.c.bf16 %v32_v11, %v31_v10  ;;  %v33_v13 = vld [vmem:[%s1491_s1 + $0x40] sm:$0xff]  ;;  %v34_v14 = vld [vmem:[%s1491_s1 + $0x48] sm:$0xff]  ;;  %v35_v16 = vld [vmem:[%s1491_s1 + $0x50] sm:$0xff] }
   0x5   :  { %948 = vmatpush3.bf16.msra.mxu0 %v945_v3  ;;  %v961_v15 = vpack.c.bf16 %v34_v14, %v33_v13  ;;  %v36_v17 = vld [vmem:[%s1491_s1 + $0x58] sm:$0xff]  ;;  %v37_v19 = vld [vmem:[%s1491_s1 + $0x60] sm:$0xff]  ;;  %v38_v20 = vld [vmem:[%s1491_s1 + $0x68] sm:$0xff] }
   0x6   :  { %950 = vmatprep.subr.bf16.mxu0 %v949_v5  ;;  %v965_v18 = vpack.c.bf16 %v36_v17, %v35_v16  ;;  %v969_v21 = vpack.c.bf16 %v38_v20, %v37_v19  ;;  %v39_v22 = vld [vmem:[%s1491_s1 + $0x70] sm:$0xff]  ;;  %v40_v23 = vld [vmem:[%s1491_s1 + $0x78] sm:$0xff]  ;;  %v22_v25 = vld [vmem:[%s1492_s0 + $0x8] sm:$0xff]  ;;  %s1085_s1 = smov 16  }
   0x7   :  { %v973_v24 = vpack.c.bf16 %v40_v23, %v39_v22  ;;  %v23_v26 = vld [vmem:[%s1492_s0 + $0x10] sm:$0xff]  ;;  %v24_v27 = vld [vmem:[%s1492_s0 + $0x18] sm:$0xff]  ;;  %s1084_s0 = smov 8   ;;  %v200_v59 = vld [vmem:[%s1493_s3 + $0x8] sm:$0xff] }
   0x8   :  { %v203_v60 = vld [vmem:[%s1493_s3 + $0x20] sm:$0xff]  ;;  %v202_v63 = vld [vmem:[%s1493_s3 + $0x18] sm:$0xff]  ;;  %v201_v0 = vld [vmem:[%s1493_s3 + $0x10] sm:$0xff] }
   0x9   :  { %952 = vmatpush3.bf16.msra.mxu0 %v949_v5  ;;  %v977_v61 = vpack.c.bf16 %v203_v60, %v200_v59  ;;  %v199_v62 = vld [vmem:[%s1493_s3] sm:$0xff]  ;;  %v204_v2 = vld [vmem:[%s1493_s3 + $0x28] sm:$0xff]  ;;  %v206_v4 = vld [vmem:[%s1493_s3 + $0x38] sm:$0xff] }
   0xa   :  { %954 = vmatprep.subr.bf16.mxu0 %v953_v8  ;;  %v979_v1 = vpack.c.bf16 %v202_v63, %v199_v62  ;;  %v1009_v3 = vpack.c.bf16 %v204_v2, %v201_v0  ;;  %v209_v5 = vld [vmem:[%s1493_s3 + $0x50] sm:$0xff]  ;;  %v207_v9 = vld [vmem:[%s1493_s3 + $0x40] sm:$0xff]  ;;  %v214_v19 = vld [vmem:[%s1493_s3 + $0x78] sm:$0xff] }
   0xb   :  { %978 = vmatprep.subr.bf16.mxu1 %v977_v61  ;;  %v981_v6 = vpack.c.bf16 %v209_v5, %v206_v4  ;;  %v205_v7 = vld [vmem:[%s1493_s3 + $0x30] sm:$0xff]  ;;  %v215_v16 = vld [vmem:[%s1493_s3 + $0x80] sm:$0xff]  ;;  %v216_v22 = vld [vmem:[%s1493_s3 + $0x88] sm:$0xff] }
   0xc   :  { %980 = vmatpush1.bf16.msra.mxu1 %v979_v1  ;;  %v213_v20 = vld [vmem:[%s1493_s3 + $0x70] sm:$0xff]  ;;  %v238_v59 = vld [vmem:[%s1493_s3 + $0x138] sm:$0xff]  ;;  %v240_v62 = vld [vmem:[%s1493_s3 + $0x148] sm:$0xff] }
   0xd   :  { %956 = vmatpush3.bf16.msra.mxu0 %v953_v8  ;;  %v208_v8 = vld [vmem:[%s1493_s3 + $0x48] sm:$0xff]  ;;  %982 = vmatprep.subr.bf16.mxu1 %v981_v6  ;;  %v1017_v23 = vpack.c.bf16 %v216_v22, %v213_v20  ;;  %v237_v60 = vld [vmem:[%s1493_s3 + $0x130] sm:$0xff]  ;;  %v242_v0 = vld [vmem:[%s1493_s3 + $0x158] sm:$0xff] }
   0xe   :  { %958 = vmatprep.subr.bf16.mxu0 %v957_v12  ;;  %v983_v11 = vpack.c.bf16 %v208_v8, %v205_v7  ;;  %v1033_v63 = vpack.c.bf16 %v240_v62, %v237_v60  ;;  %v245_v1 = vld [vmem:[%s1493_s3 + $0x170] sm:$0xff]  ;;  %v244_v4 = vld [vmem:[%s1493_s3 + $0x168] sm:$0xff]  ;;  %v243_v5 = vld [vmem:[%s1493_s3 + $0x160] sm:$0xff]  ;;  %v1088_v8 = vmov 0.0  }
   0xf   :  { %v1005_v2 = vpack.c.bf16 %v245_v1, %v242_v0  ;;  %v246_v7 = vld [vmem:[%s1493_s3 + $0x178] sm:$0xff]  ;;  %311 = vmatprep.mubr.f32.mxu1 %v1088_v8 }
  0x10   :  { %984 = vmatpush1.bf16.msra.mxu1 %v983_v11 }
  0x11   :  { %960 = vmatpush3.bf16.msra.mxu0 %v957_v12  ;;  %v210_v12 = vld [vmem:[%s1493_s3 + $0x58] sm:$0xff] }
  0x12   :  { %962 = vmatprep.subr.bf16.mxu0 %v961_v15  ;;  %v1013_v14 = vpack.c.bf16 %v210_v12, %v207_v9  ;;  %v1037_v9 = vpack.c.bf16 %v246_v7, %v243_v5 }
  0x15   :  { %964 = vmatpush3.bf16.msra.mxu0 %v961_v15  ;;  %v212_v15 = vld [vmem:[%s1493_s3 + $0x68] sm:$0xff] }
  0x16   :  { %966 = vmatprep.subr.bf16.mxu0 %v965_v18  ;;  %v985_v17 = vpack.c.bf16 %v215_v16, %v212_v15 }
  0x18   :  { %986 = vmatprep.subr.bf16.mxu1 %v985_v17 }
  0x19   :  { %968 = vmatpush3.bf16.msra.mxu0 %v965_v18  ;;  %v211_v18 = vld [vmem:[%s1493_s3 + $0x60] sm:$0xff] }
  0x1a   :  { %970 = vmatprep.subr.bf16.mxu0 %v969_v21 }
  0x1d   :  { %972 = vmatpush3.bf16.msra.mxu0 %v969_v21  ;;  %v987_v21 = vpack.c.bf16 %v214_v19, %v211_v18  ;;  %v179_v18 = vlaneseq }
  0x1e   :  { %974 = vmatprep.subr.bf16.mxu0 %v973_v24 }
  0x1f   :  { %988 = vmatpush1.bf16.msra.mxu1 %v987_v21  ;;  %v1352_v19 = vshrl.u32 %v179_v18, 7  ;;  %v1357_v21 = vld [vmem:[%s1494_s4] sm:$0x3f] }
  0x21   :  { %976 = vmatpush3.bf16.msra.mxu0 %v973_v24  ;;  %v218_v24 = vld [vmem:[%s1493_s3 + $0x98] sm:$0xff]  ;;  %vm503_vm1 = vcmp.lt.s32.totalorder %v1352_v19, 7  ;;  %vm482_vm2 = vcmp.lt.s32.totalorder %v1352_v19, 1  ;;  %v425_v60 = vadd.s32 24, %v1352_v19 }
  0x22   :  { %1010 = vmatprep.subr.bf16.mxu0 %v1009_v3 }
  0x24   :  { %864 = vmatmul.mubr.f32.vlgmr.msra.gmra.mrb[0].mxu0 %v22_v25  ;;  %v221_v25 = vld [vmem:[%s1493_s3 + $0xb0] sm:$0xff] }
  0x25   :  { %866 = vmatprep.mubr.f32.mxu0 %v23_v26  ;;  %1012 = vmatpush3.bf16.msra.mxu0 %v1009_v3  ;;  %v989_v26 = vpack.c.bf16 %v221_v25, %v218_v24  ;;  %v241_v3 = vld [vmem:[%s1493_s3 + $0x150] sm:$0xff]  ;;  %v189_v25 = vsub.s32 1, %v1352_v19 }
  0x26   :  { %1014 = vmatprep.subr.bf16.mxu0 %v1013_v14  ;;  %v1007_v6 = vpack.c.bf16 %v244_v4, %v241_v3 }
  0x27   :  { %990 = vmatprep.subr.bf16.mxu1 %v989_v26 }
  0x28   :  { %867 = vmatmul.mubr.f32.gmra.mrb[2].mxu0 %v24_v27  ;;  %v217_v27 = vld [vmem:[%s1493_s3 + $0x90] sm:$0xff] }
  0x29   :  { %1016 = vmatpush3.bf16.msra.mxu0 %v1013_v14 }
  0x2a   :  { %1018 = vmatprep.subr.bf16.mxu0 %v1017_v23 }
  0x2d   :  { %1020 = vmatpush3.bf16.msra.mxu0 %v1017_v23  ;;  %v181_v23 = vsub.s32 0, %v1352_v19 }
  0xf7   :  { %v1179_v28 = vpop.f32.mrb[0].mxu0 }
  0xf8   :  { %v136_v29 = vmul.f32 %v1179_v28, %v1179_v28  ;;  %v1183_v30 = vpop.f32.mrb[1].mxu0 }
  0xf9   :  { %v126_v31 = vadd.f32 %v1179_v28, %v1183_v30  ;;  %v135_v32 = vmul.f32 %v1183_v30, %v1183_v30 }
  0xfb   :  { %v139_v33 = vadd.f32 %v136_v29, %v135_v32  ;;  %v1189_v34 = vpop.f32.mrb[2].mxu0  ;;  %v220_v29 = vld [vmem:[%s1493_s3 + $0xa8] sm:$0xff] }
  0xfc   :  { %v1191_v35 = vpop.f32.mrb[3].mxu0  ;;  %v138_v38 = vmul.f32 %v1189_v34, %v1189_v34  ;;  %v991_v32 = vpack.c.bf16 %v220_v29, %v217_v27 }
  0xfd   :  { %v127_v36 = vadd.f32 %v126_v31, %v1191_v35  ;;  %v137_v37 = vmul.f32 %v1191_v35, %v1191_v35  ;;  %v219_v31 = vld [vmem:[%s1493_s3 + $0xa0] sm:$0xff] }
  0xfe   :  { %992 = vmatpush1.bf16.msra.mxu1 %v991_v32 }
  0xff   :  { %v128_v39 = vadd.f32 %v1189_v34, %v127_v36  ;;  %v140_v40 = vadd.f32 %v139_v33, %v137_v37  ;;  %v222_v33 = vld [vmem:[%s1493_s3 + $0xb8] sm:$0xff]  ;;  %v224_v37 = vld [vmem:[%s1493_s3 + $0xc8] sm:$0xff] }
 0x100   :  { %v1021_v36 = vpack.c.bf16 %v222_v33, %v219_v31 }
 0x101   :  { %v129_v41 = vrot.slane %v128_v39, 4  ;;  %v141_v42 = vadd.f32 %v140_v40, %v138_v38  ;;  %v227_v38 = vld [vmem:[%s1493_s3 + $0xe0] sm:$0xff] }
 0x102   :  { %1022 = vmatprep.subr.bf16.mxu0 %v1021_v36  ;;  %v223_v40 = vld [vmem:[%s1493_s3 + $0xc0] sm:$0xff] }
 0x103   :  { %v130_v43 = vadd.f32 %v129_v41, %v128_v39  ;;  %v142_v44 = vrot.slane %v141_v42, 4  ;;  %v993_v39 = vpack.c.bf16 %v227_v38, %v224_v37  ;;  %v226_v41 = vld [vmem:[%s1493_s3 + $0xd8] sm:$0xff]  ;;  %1024 = vmatpush3.bf16.msra.mxu0 %v1021_v36 }
 0x105   :  { %v131_v45 = vrot.slane %v130_v43, 2  ;;  %v143_v46 = vadd.f32 %v142_v44, %v141_v42  ;;  %v225_v42 = vld [vmem:[%s1493_s3 + $0xd0] sm:$0xff]  ;;  %v228_v44 = vld [vmem:[%s1493_s3 + $0xe8] sm:$0xff]  ;;  %994 = vmatprep.subr.bf16.mxu1 %v993_v39 }
 0x107   :  { %v132_v47 = vadd.f32 %v131_v45, %v130_v43  ;;  %v144_v48 = vrot.slane %v143_v46, 2  ;;  %v995_v43 = vpack.c.bf16 %v226_v41, %v223_v40  ;;  %v1025_v45 = vpack.c.bf16 %v228_v44, %v225_v42 }
 0x109   :  { %v133_v49 = vrot.slane %v132_v47, 1  ;;  %v145_v50 = vadd.f32 %v144_v48, %v143_v46  ;;  %996 = vmatpush1.bf16.msra.mxu1 %v995_v43  ;;  %v230_v46 = vld [vmem:[%s1493_s3 + $0xf8] sm:$0xff]  ;;  %1026 = vmatprep.subr.bf16.mxu0 %v1025_v45 }
 0x10a   :  { %1028 = vmatpush3.bf16.msra.mxu0 %v1025_v45 }
 0x10b   :  { %v146_v51 = vrot.slane %v145_v50, 1  ;;  %v134_v52 = vadd.f32 %v133_v49, %v132_v47  ;;  %v233_v47 = vld [vmem:[%s1493_s3 + $0x110] sm:$0xff] }
 0x10c   :  { %v997_v48 = vpack.c.bf16 %v233_v47, %v230_v46  ;;  %v229_v49 = vld [vmem:[%s1493_s3 + $0xf0] sm:$0xff] }
 0x10d   :  { %v147_v53 = vadd.f32 %v146_v51, %v145_v50  ;;  %v232_v50 = vld [vmem:[%s1493_s3 + $0x108] sm:$0xff]  ;;  %v231_v51 = vld [vmem:[%s1493_s3 + $0x100] sm:$0xff] }
 0x10e   :  { %998 = vmatprep.subr.bf16.mxu1 %v997_v48 }
 0x10f   :  { %v149_v54 = vsel %vm148_vm0, %v134_v52, %v147_v53  ;;  %v999_v52 = vpack.c.bf16 %v232_v50, %v229_v49  ;;  %v234_v53 = vld [vmem:[%s1493_s3 + $0x118] sm:$0xff] }
 0x110   :  { %150 = vrot.lane.b32.xlu0 %v149_v54, %s1084_s0 }
 0x111   :  { %1000 = vmatpush1.bf16.msra.mxu1 %v999_v52 }
 0x182   :  { %v151_v55 = vpop.permute.xlu0 %150 }
 0x183   :  { %v152_v56 = vadd.f32 %v151_v55, %v149_v54  ;;  %v1029_v54 = vpack.c.bf16 %v234_v53, %v231_v51  ;;  %v236_v55 = vld [vmem:[%s1493_s3 + $0x128] sm:$0xff] }
 0x185   :  { %153 = vrot.lane.b32.xlu0 %v152_v56, %s1085_s1  ;;  %1030 = vmatprep.subr.bf16.mxu0 %v1029_v54 }
 0x186   :  { %1032 = vmatpush3.bf16.msra.mxu0 %v1029_v54 }
 0x187   :  { %1034 = vmatprep.subr.bf16.mxu0 %v1033_v63 }
 0x18a   :  { %1036 = vmatpush3.bf16.msra.mxu0 %v1033_v63 }
 0x18b   :  { %1038 = vmatprep.subr.bf16.mxu0 %v1037_v9 }
 0x18e   :  { %1040 = vmatpush3.bf16.msra.mxu0 %v1037_v9 }
 0x1f7   :  { %v154_v57 = vpop.permute.xlu0 %153 }
 0x1f8   :  { %v155_v58 = vadd.f32 %v154_v57, %v152_v56  ;;  %v239_v56 = vld [vmem:[%s1493_s3 + $0x140] sm:$0xff] }
 0x1f9   :  { %v1001_v57 = vpack.c.bf16 %v239_v56, %v236_v55 }
 0x1fa   :  { %156 = vrot.lane.b32.xlu1 %v155_v58, %s1086_s8 }
 0x1fb   :  { %1002 = vmatprep.subr.bf16.mxu1 %v1001_v57 }
 0x26c   :  { %v157_v10 = vpop.permute.xlu1 %156 }
 0x26d   :  { %v1239_v13 = vadd.f32 %v157_v10, %v155_v58  ;;  %v235_v58 = vld [vmem:[%s1493_s3 + $0x120] sm:$0xff] }
 0x26e   :  { %v1003_v61 = vpack.c.bf16 %v238_v59, %v235_v58 }
 0x26f   :  { %159 = vrot.lane.b32.xlu1 %v1239_v13, %s1087_s13 }
 0x270   :  { %1004 = vmatpush1.bf16.msra.mxu1 %v1003_v61 }
 0x271   :  { %1006 = vmatprep.subr.bf16.mxu1 %v1005_v2 }
 0x274   :  { %1008 = vmatpush1.bf16.msra.mxu1 %v1007_v6  ;;  %v430_v6 = vand.u32 15, %v1352_v19 }
 0x276   :  { %vm474_vm5 = vcmp.ne.s32.totalorder %v430_v6, 0 }
 0x2e1   :  { %v160_v10 = vpop.permute.xlu1 %159 }
 0x2e2   :  { %v161_v11 = vadd.f32 %v160_v10, %v1239_v13 }
 0x2e4   :  { %v162_v12 = vmul.f32 0.001953125, %v161_v11 }
 0x2e6   :  { %v163_v14 = vmul.f32 %v162_v12, %v162_v12 }
 0x2e8   :  { %v165_v15 = vrot.slane %v163_v14, 7 }
 0x2ea   :  { %v167_v16 = vsub.f32 %v162_v12, %v165_v15 }
 0x2ec   :  { %v168_v17 = vadd.f32 1e-05, %v167_v16 }
 0x2ee   :  { %1078 = vrsqrt.f32 %v168_v17 }
 0x2f8   :  { %v1079_v20 = vpop.eup %1078 }
 0x2f9   :  { %v171_v22 = vrot.slane %v1079_v20, 1 }
 0x2fb   :  { %v173_v13 = vmul.f32 %v171_v22, %v1357_v21 }
 0x2fd   :  { %v174_v24 = vmul.f32 %v173_v13, %v162_v12  ;;  %v182_v27 = vrot.slane %v173_v13, %v181_v23 }
 0x2ff   :  { %v176_v26 = vrot.slane %v174_v24, 7  ;;  %v183_v32 = vmul.f32 %v182_v27, %v1183_v30  ;;  %v184_v33 = vmul.f32 %v1179_v28, %v182_v27  ;;  %v185_v36 = vmul.f32 %v182_v27, %v1191_v35 }
 0x300   :  { %v186_v40 = vmul.f32 %v1189_v34, %v182_v27  ;;  %v423_v28 = vadd.s32 8, %v1352_v19  ;;  %v424_v34 = vadd.s32 16, %v1352_v19 }
 0x301   :  { %v178_v29 = vsub.f32 %v1357_v21, %v176_v26 }
 0x302   :  { %v437_v50 = vand.u32 15, %v423_v28  ;;  %v444_v52 = vand.u32 15, %v424_v34 }
 0x303   :  { %v190_v31 = vrot.slane %v178_v29, %v189_v25 }
 0x304   :  { %vm496_vm3 = vcmp.ne.s32.totalorder %v437_v50, 15  ;;  %vm476_vm4 = vcmp.ne.s32.totalorder %v444_v52, 0 }
 0x305   :  { %v191_v37 = vadd.f32 %v190_v31, %v183_v32  ;;  %v192_v38 = vadd.f32 %v190_v31, %v184_v33  ;;  %v193_v39 = vadd.f32 %v190_v31, %v185_v36  ;;  %v194_v43 = vadd.f32 %v190_v31, %v186_v40 }
 0x307   :  { %v195_v41 = vmax.f32 %v191_v37, 0.0  ;;  %v196_v42 = vmax.f32 %v192_v38, 0.0  ;;  %v197_v44 = vmax.f32 %v193_v39, 0.0  ;;  %v198_v45 = vmax.f32 %v194_v43, 0.0 }
 0x309   :  { %312 = vmatmul.mubr.f32.vlgmr.msra.gmra.mrb[0].mxu1 %v195_v41  ;;  %901 = vmatprep.mubr.f32.mxu0 %v195_v41 }
 0x30a   :  { %902 = vmatmul.mubr.f32.vlgmr.msra.gmra.mrb[4].mxu0 %v196_v42  ;;  %317 = vmatprep.mubr.f32.mxu1 %v1088_v8 }
 0x30b   :  { %904 = vmatprep.mubr.f32.mxu0 %v197_v44 }
 0x30d   :  { %318 = vmatmul.mubr.f32.gmra.mrb[2].mxu1 %v196_v42 }
 0x30e   :  { %905 = vmatmul.mubr.f32.gmra.mrb[6].mxu0 %v198_v45  ;;  %323 = vmatprep.mubr.f32.mxu1 %v1088_v8 }
 0x311   :  { %324 = vmatmul.mubr.f32.gmra.mrb[4].mxu1 %v197_v44 }
 0x312   :  { %329 = vmatprep.mubr.f32.mxu1 %v1088_v8  ;;  %v451_v8 = vand.u32 15, %v425_v60 }
 0x314   :  { %vm498_vm6 = vcmp.ne.s32.totalorder %v451_v8, 15  ;;  %v598_v8 = vld [vmem:[%s1495_s2 + $0x58] sm:$0xff] }
 0x315   :  { %330 = vmatmul.mubr.f32.gmra.mrb[6].mxu1 %v198_v45 }
 0x3dc   :  { %v313_v30 = vpop.f32.mrb[0].mxu1 }
 0x3dd   :  { %v315_v35 = vpop.f32.mrb[1].mxu1  ;;  %v903_v46 = vpop.f32.mrb[4].mxu0  ;;  %v478_v53 = vrot.slane %v313_v30, 7 }
 0x3de   :  { %v500_v47 = vrot.slane %v903_v46, 1  ;;  %v402_v48 = vpop.f32.mrb[5].mxu0 }
 0x3df   :  { %v499_v49 = vrot.slane %v402_v48, 1 }
 0x3e0   :  { %v319_v51 = vpop.f32.mrb[2].mxu1 }
 0x3e1   :  { %v506_v54 = vsel %vm503_vm1, %v499_v49, %v500_v47  ;;  %v479_v55 = vrot.slane %v319_v51, 7  ;;  %v321_v56 = vpop.f32.mrb[3].mxu1  ;;  %v906_v57 = vpop.f32.mrb[6].mxu0 }
 0x3e2   :  { %v502_v58 = vrot.slane %v906_v57, 1  ;;  %v412_v59 = vpop.f32.mrb[7].mxu0 }
 0x3e3   :  { %v485_v61 = vsel %vm482_vm2, %v478_v53, %v479_v55  ;;  %v501_v62 = vrot.slane %v412_v59, 1  ;;  %v590_v59 = vld [vmem:[%s1495_s2 + $0x18] sm:$0xff] }
 0x3e4   :  { %v492_v63 = vadd.f32 %v485_v61, %v321_v56  ;;  %v325_v0 = vpop.f32.mrb[4].mxu1  ;;  %v507_v1 = vsel %vm503_vm1, %v502_v58, %v499_v49 }
 0x3e5   :  { %v505_v2 = vsel %vm503_vm1, %v500_v47, %v501_v62  ;;  %v480_v3 = vrot.slane %v325_v0, 7  ;;  %v327_v4 = vpop.f32.mrb[5].mxu1  ;;  %v504_v5 = vsel %vm503_vm1, %v501_v62, %v502_v58  ;;  %v511_v24 = vsel %vm498_vm6, %v507_v1, 0.0  ;;  %v589_v58 = vld [vmem:[%s1495_s2 + $0x10] sm:$0xff]  ;;  %v591_v62 = vld [vmem:[%s1495_s2 + $0x20] sm:$0xff] }
 0x3e6   :  { %v509_v7 = vsel %vm496_vm3, %v505_v2, 0.0  ;;  %v1045_v61 = vpack.c.bf16 %v590_v59, %v589_v58  ;;  %v593_v1 = vld [vmem:[%s1495_s2 + $0x30] sm:$0xff]  ;;  %v594_v2 = vld [vmem:[%s1495_s2 + $0x38] sm:$0xff] }
 0x3e7   :  { %v1383_v9 = vadd.f32 %v509_v7, %v492_v63  ;;  %v484_v10 = vsel %vm482_vm2, %v479_v55, %v480_v3  ;;  %v588_v55 = vld [vmem:[%s1495_s2 + $0x8] sm:$0xff]  ;;  %v597_v7 = vld [vmem:[%s1495_s2 + $0x50] sm:$0xff] }
 0x3e8   :  { %v489_v11 = vsel %vm476_vm4, %v484_v10, 0.0  ;;  %v331_v12 = vpop.f32.mrb[6].mxu1  ;;  %v592_v63 = vld [vmem:[%s1495_s2 + $0x28] sm:$0xff]  ;;  %v1061_v10 = vpack.c.bf16 %v598_v8, %v597_v7 }
 0x3e9   :  { %v493_v14 = vadd.f32 %v489_v11, %v327_v4  ;;  %v481_v15 = vrot.slane %v331_v12, 7  ;;  %v333_v16 = vpop.f32.mrb[7].mxu1  ;;  %v526_v27 = vmul.f32 %v1383_v9, %v1383_v9  ;;  %v1049_v0 = vpack.c.bf16 %v592_v63, %v591_v62  ;;  %v595_v4 = vld [vmem:[%s1495_s2 + $0x40] sm:$0xff]  ;;  %v600_v12 = vld [vmem:[%s1495_s2 + $0x68] sm:$0xff] }
 0x3ea   :  { %v599_v11 = vld [vmem:[%s1495_s2 + $0x60] sm:$0xff] }
 0x3eb   :  { %v1387_v17 = vadd.f32 %v504_v5, %v493_v14  ;;  %v486_v18 = vsel %vm482_vm2, %v481_v15, %v478_v53  ;;  %v483_v20 = vsel %vm482_vm2, %v480_v3, %v481_v15  ;;  %v1053_v3 = vpack.c.bf16 %v594_v2, %v593_v1  ;;  %v596_v5 = vld [vmem:[%s1495_s2 + $0x48] sm:$0xff]  ;;  %v601_v15 = vld [vmem:[%s1495_s2 + $0x70] sm:$0xff] }
 0x3ec   :  { %v487_v22 = vsel %vm474_vm5, %v486_v18, 0.0  ;;  %v494_v23 = vadd.f32 %v483_v20, %v333_v16  ;;  %v1057_v6 = vpack.c.bf16 %v596_v5, %v595_v4  ;;  %v1065_v14 = vpack.c.bf16 %v600_v12, %v599_v11  ;;  %v602_v16 = vld [vmem:[%s1495_s2 + $0x78] sm:$0xff] }
 0x3ed   :  { %v491_v13 = vadd.f32 %v487_v22, %v315_v35  ;;  %v527_v32 = vmul.f32 %v1387_v17, %v1387_v17  ;;  %v1069_v18 = vpack.c.bf16 %v602_v16, %v601_v15 }
 0x3ee   :  { %v1393_v25 = vadd.f32 %v511_v24, %v494_v23 }
 0x3ef   :  { %v1395_v26 = vadd.f32 %v506_v54, %v491_v13  ;;  %v587_v54 = vld [vmem:[%s1495_s2] sm:$0xff] }
 0x3f0   :  { %v528_v38 = vmul.f32 %v1393_v25, %v1393_v25  ;;  %v1041_v56 = vpack.c.bf16 %v588_v55, %v587_v54 }
 0x3f1   :  { %v525_v29 = vmul.f32 %v1395_v26, %v1395_v26  ;;  %v516_v31 = vadd.f32 %v1383_v9, %v1395_v26 }
 0x3f2   :  { %1042 = vmatprep.subr.bf16.mxu1 %v1041_v56 }
 0x3f3   :  { %v517_v33 = vadd.f32 %v516_v31, %v1387_v17  ;;  %v529_v36 = vadd.f32 %v526_v27, %v525_v29  ;;  %1044 = vmatpush3.bf16.msra.mxu1 %v1041_v56 }
 0x3f4   :  { %1046 = vmatprep.subr.bf16.mxu1 %v1045_v61 }
 0x3f5   :  { %v518_v37 = vadd.f32 %v517_v33, %v1393_v25  ;;  %v530_v39 = vadd.f32 %v529_v36, %v527_v32  ;;  %v573_v36 = vsub.s32 2, %v1352_v19 }
 0x3f7   :  { %v519_v40 = vrot.slane %v518_v37, 4  ;;  %v531_v41 = vadd.f32 %v530_v39, %v528_v38  ;;  %1048 = vmatpush3.bf16.msra.mxu1 %v1045_v61  ;;  %v581_v39 = vsub.s32 3, %v1352_v19 }
 0x3f8   :  { %1050 = vmatprep.subr.bf16.mxu1 %v1049_v0 }
 0x3f9   :  { %v520_v42 = vadd.f32 %v519_v40, %v518_v37  ;;  %v532_v43 = vrot.slane %v531_v41, 4 }
 0x3fb   :  { %v521_v44 = vrot.slane %v520_v42, 2  ;;  %v533_v45 = vadd.f32 %v532_v43, %v531_v41  ;;  %1052 = vmatpush3.bf16.msra.mxu1 %v1049_v0 }
 0x3fc   :  { %1054 = vmatprep.subr.bf16.mxu1 %v1053_v3 }
 0x3fd   :  { %v522_v28 = vadd.f32 %v521_v44, %v520_v42  ;;  %v534_v30 = vrot.slane %v533_v45, 2 }
 0x3ff   :  { %v523_v34 = vrot.slane %v522_v28, 1  ;;  %v535_v35 = vadd.f32 %v534_v30, %v533_v45  ;;  %1056 = vmatpush3.bf16.msra.mxu1 %v1053_v3 }
 0x400   :  { %1058 = vmatprep.subr.bf16.mxu1 %v1057_v6 }
 0x401   :  { %v536_v46 = vrot.slane %v535_v35, 1  ;;  %v524_v47 = vadd.f32 %v523_v34, %v522_v28 }
 0x403   :  { %v537_v48 = vadd.f32 %v536_v46, %v535_v35  ;;  %1060 = vmatpush3.bf16.msra.mxu1 %v1057_v6 }
 0x404   :  { %1062 = vmatprep.subr.bf16.mxu1 %v1061_v10 }
 0x405   :  { %v538_v49 = vsel %vm148_vm0, %v524_v47, %v537_v48 }
 0x406   :  { %539 = vrot.lane.b32.xlu0 %v538_v49, %s1084_s0 }
 0x407   :  { %1064 = vmatpush3.bf16.msra.mxu1 %v1061_v10 }
 0x408   :  { %1066 = vmatprep.subr.bf16.mxu1 %v1065_v14 }
 0x40b   :  { %1068 = vmatpush3.bf16.msra.mxu1 %v1065_v14 }
 0x40c   :  { %1070 = vmatprep.subr.bf16.mxu1 %v1069_v18 }
 0x40f   :  { %1072 = vmatpush3.bf16.msra.mxu1 %v1069_v18 }
 0x478   :  { %v540_v50 = vpop.permute.xlu0 %539 }
 0x479   :  { %v541_v51 = vadd.f32 %v540_v50, %v538_v49 }
 0x47b   :  { %542 = vrot.lane.b32.xlu1 %v541_v51, %s1085_s1 }
 0x4ed   :  { %v543_v52 = vpop.permute.xlu1 %542 }
 0x4ee   :  { %v544_v53 = vadd.f32 %v543_v52, %v541_v51 }
 0x4f0   :  { %545 = vrot.lane.b32.xlu0 %v544_v53, %s1086_s8 }
 0x562   :  { %v546_v57 = vpop.permute.xlu0 %545 }
 0x563   :  { %v547_v60 = vadd.f32 %v546_v57, %v544_v53 }
 0x565   :  { %548 = vrot.lane.b32.xlu1 %v547_v60, %s1087_s13 }
 0x5d7   :  { %v549_v20 = vpop.permute.xlu1 %548 }
 0x5d8   :  { %v550_v22 = vadd.f32 %v549_v20, %v547_v60 }
 0x5da   :  { %v551_v23 = vmul.f32 0.001953125, %v550_v22 }
 0x5dc   :  { %v552_v13 = vmul.f32 %v551_v23, %v551_v23 }
 0x5de   :  { %v554_v24 = vrot.slane %v552_v13, 7 }
 0x5e0   :  { %v556_v27 = vsub.f32 %v551_v23, %v554_v24 }
 0x5e2   :  { %v557_v29 = vadd.f32 1e-05, %v556_v27 }
 0x5e4   :  { %1080 = vrsqrt.f32 %v557_v29 }
 0x5ee   :  { %v1081_v31 = vpop.eup %1080 }
 0x5ef   :  { %v560_v32 = vrot.slane %v1081_v31, 7  ;;  %v745_v31 = vsub.s32 4, %v1352_v19 }
 0x5f1   :  { %v562_v33 = vmul.f32 %v560_v32, %v1357_v21 }
 0x5f3   :  { %v564_v37 = vrot.slane %v562_v33, 2  ;;  %v574_v41 = vrot.slane %v562_v33, %v573_v36 }
 0x5f5   :  { %v566_v38 = vmul.f32 %v564_v37, %v551_v23  ;;  %v575_v44 = vmul.f32 %v574_v41, %v1395_v26  ;;  %v576_v45 = vmul.f32 %v574_v41, %v1383_v9  ;;  %v577_v34 = vmul.f32 %v574_v41, %v1387_v17 }
 0x5f6   :  { %v578_v46 = vmul.f32 %v574_v41, %v1393_v25  ;;  %v753_v37 = vsub.s32 5, %v1352_v19 }
 0x5f7   :  { %v568_v40 = vrot.slane %v566_v38, 5 }
 0x5f9   :  { %v570_v42 = vsub.f32 %v1357_v21, %v568_v40 }
 0x5fb   :  { %v582_v43 = vrot.slane %v570_v42, %v581_v39 }
 0x5fd   :  { %v583_v28 = vadd.f32 %v582_v43, %v575_v44  ;;  %v584_v30 = vadd.f32 %v582_v43, %v576_v45  ;;  %v585_v35 = vadd.f32 %v582_v43, %v577_v34  ;;  %v586_v47 = vadd.f32 %v582_v43, %v578_v46 }
 0x5ff   :  { %939 = vmatprep.mubr.f32.mxu1 %v583_v28 }
 0x600   :  { %940 = vmatmul.mubr.f32.vlgmr.msra.gmra.mrb[8].mxu1 %v584_v30 }
 0x601   :  { %942 = vmatprep.mubr.f32.mxu1 %v585_v35 }
 0x604   :  { %943 = vmatmul.mubr.f32.gmra.mrb[10].mxu1 %v586_v47 }
 0x6d3   :  { %v941_v48 = vpop.f32.mrb[8].mxu1 }
 0x6d4   :  { %v698_v49 = vmul.f32 %v941_v48, %v941_v48  ;;  %v669_v50 = vpop.f32.mrb[9].mxu1 }
 0x6d5   :  { %v688_v51 = vadd.f32 %v941_v48, %v669_v50  ;;  %v697_v52 = vmul.f32 %v669_v50, %v669_v50 }
 0x6d7   :  { %v701_v26 = vadd.f32 %v698_v49, %v697_v52  ;;  %v944_v53 = vpop.f32.mrb[10].mxu1 }
 0x6d8   :  { %v679_v9 = vpop.f32.mrb[11].mxu1  ;;  %v700_v56 = vmul.f32 %v944_v53, %v944_v53 }
 0x6d9   :  { %v689_v54 = vadd.f32 %v688_v51, %v679_v9  ;;  %v699_v55 = vmul.f32 %v679_v9, %v679_v9 }
 0x6db   :  { %v690_v17 = vadd.f32 %v944_v53, %v689_v54  ;;  %v702_v57 = vadd.f32 %v701_v26, %v699_v55 }
 0x6dd   :  { %v691_v58 = vrot.slane %v690_v17, 4  ;;  %v703_v59 = vadd.f32 %v702_v57, %v700_v56 }
 0x6df   :  { %v692_v60 = vadd.f32 %v691_v58, %v690_v17  ;;  %v704_v25 = vrot.slane %v703_v59, 4 }
 0x6e1   :  { %v693_v61 = vrot.slane %v692_v60, 2  ;;  %v705_v62 = vadd.f32 %v704_v25, %v703_v59 }
 0x6e3   :  { %v694_v63 = vadd.f32 %v693_v61, %v692_v60  ;;  %v706_v0 = vrot.slane %v705_v62, 2 }
 0x6e5   :  { %v695_v1 = vrot.slane %v694_v63, 1  ;;  %v707_v2 = vadd.f32 %v706_v0, %v705_v62 }
 0x6e7   :  { %v708_v3 = vrot.slane %v707_v2, 1  ;;  %v696_v4 = vadd.f32 %v695_v1, %v694_v63 }
 0x6e9   :  { %v709_v5 = vadd.f32 %v708_v3, %v707_v2 }
 0x6eb   :  { %v710_v6 = vsel %vm148_vm0, %v696_v4, %v709_v5 }
 0x6ec   :  { %711 = vrot.lane.b32.xlu0 %v710_v6, %s1084_s0 }
 0x75e   :  { %v712_v7 = vpop.permute.xlu0 %711 }
 0x75f   :  { %v713_v8 = vadd.f32 %v712_v7, %v710_v6 }
 0x761   :  { %714 = vrot.lane.b32.xlu1 %v713_v8, %s1085_s1 }
 0x7d3   :  { %v715_v10 = vpop.permute.xlu1 %714 }
 0x7d4   :  { %v716_v11 = vadd.f32 %v715_v10, %v713_v8 }
 0x7d6   :  { %717 = vrot.lane.b32.xlu0 %v716_v11, %s1086_s8 }
 0x848   :  { %v718_v12 = vpop.permute.xlu0 %717 }
 0x849   :  { %v719_v14 = vadd.f32 %v718_v12, %v716_v11 }
 0x84b   :  { %720 = vrot.lane.b32.xlu1 %v719_v14, %s1087_s13 }
 0x8bd   :  { %v721_v15 = vpop.permute.xlu1 %720 }
 0x8be   :  { %v722_v16 = vadd.f32 %v721_v15, %v719_v14 }
 0x8c0   :  { %v723_v18 = vmul.f32 0.001953125, %v722_v16 }
 0x8c2   :  { %v724_v20 = vmul.f32 %v723_v18, %v723_v18 }
 0x8c4   :  { %v726_v22 = vrot.slane %v724_v20, 7 }
 0x8c6   :  { %v728_v23 = vsub.f32 %v723_v18, %v726_v22 }
 0x8c8   :  { %v729_v13 = vadd.f32 1e-05, %v728_v23 }
 0x8ca   :  { %1082 = vrsqrt.f32 %v729_v13 }
 0x8d4   :  { %v1083_v24 = vpop.eup %1082 }
 0x8d5   :  { %v732_v27 = vrot.slane %v1083_v24, 5 }
 0x8d7   :  { %v734_v29 = vmul.f32 %v732_v27, %v1357_v21 }
 0x8d9   :  { %v736_v32 = vrot.slane %v734_v29, 4  ;;  %v746_v36 = vrot.slane %v734_v29, %v745_v31 }
 0x8db   :  { %v738_v33 = vmul.f32 %v736_v32, %v723_v18  ;;  %v747_v40 = vmul.f32 %v746_v36, %v669_v50  ;;  %v748_v41 = vmul.f32 %v941_v48, %v746_v36  ;;  %v749_v42 = vmul.f32 %v746_v36, %v679_v9 }
 0x8dc   :  { %v750_v43 = vmul.f32 %v944_v53, %v746_v36 }
 0x8dd   :  { %v740_v38 = vrot.slane %v738_v33, 3 }
 0x8df   :  { %v742_v39 = vsub.f32 %v1357_v21, %v740_v38 }
 0x8e1   :  { %v754_v44 = vrot.slane %v742_v39, %v753_v37 }
 0x8e3   :  { %v755_v45 = vadd.f32 %v754_v44, %v747_v40  ;;  %v756_v28 = vadd.f32 %v754_v44, %v748_v41  ;;  %v757_v30 = vadd.f32 %v754_v44, %v749_v42  ;;  %v758_v34 = vadd.f32 %v754_v44, %v750_v43 }
 0x8e5   :  { %v759_v35 = vmax.f32 %v755_v45, 0.0  ;;  %v760_v46 = vmax.f32 %v756_v28, 0.0  ;;  %v761_v47 = vmax.f32 %v757_v30, 0.0  ;;  %v762_v49 = vmax.f32 %v758_v34, 0.0 }
 0x8e7   :  { %763 = vst [vmem:[%s1496_s5] sm:$0xff] %v759_v35  ;;  %764 = vst [vmem:[%s1496_s5 + $0x8] sm:$0xff] %v760_v46 }
 0x8e8   :  { %765 = vst [vmem:[%s1496_s5 + $0x10] sm:$0xff] %v761_v47  ;;  %766 = vst [vmem:[%s1496_s5 + $0x18] sm:$0xff] %v762_v49 }

</bundles_post_ra>
